<compile_context>
chip_gen: v5e
topology: v5e:2x2
jax: 0.10.0
libtpu: 0.0.40
codegen_flags: <defaults>
</compile_context>

<pallas_src>
import functools

import jax
import jax.numpy as jnp
from jax import lax
from jax.experimental import pallas as pl
from jax.experimental.pallas import tpu as pltpu

_LANE = 128
_SUBLANE = 8
_MiB = 1024 * 1024


def _cdiv(a, b):
    return -(-a // b)


@functools.lru_cache(maxsize=1)
def _vmem_capacity_bytes():
    """Physical VMEM per core; conservative 64 MiB (v7x-class) if undetectable."""
    try:
        return int(pltpu.get_tpu_info().vmem_capacity_bytes)
    except Exception:  # fall back to the smallest generation
        return 64 * _MiB


def _vmem_budgets():
    """(fused_vmem_budget, vmem_limit_bytes), generation aware.

    v7x: 64 MiB VMEM per TensorCore -> fused working set <= 36 MiB, scoped
    limit 48 MiB.  v5e/v6e: 128 MiB -> 48 / 64 MiB.  Passing vmem_limit_bytes
    also lifts v5e's 16 MiB default scoped limit.
    """
    if _vmem_capacity_bytes() <= 96 * _MiB:      # v7x-class
        return 36 * _MiB, 48 * _MiB
    return 48 * _MiB, 64 * _MiB                  # v5e / v6e-class


def _pick_f_tile(f, min_tiles):
    """Lane-dense feature tile.

    Prefers wide tiles (512/256 lanes -> 2 KiB / 1 KiB contiguous DMA rows,
    masked last tile for awkward F) but guarantees at least `min_tiles`
    feature tiles when F > 128 so the grid pipelines and both v7x
    TensorCores get work.
    """
    if f <= _LANE:
        return f                                  # single full-width tile
    for cand in (4 * _LANE, 2 * _LANE):
        if _cdiv(f, cand) >= min_tiles:
            return cand
    return _LANE                                  # F > 128 -> >= 2 tiles of 128


def _pick_n_tile(n, f_tile):
    """Batch tile targeting ~2 MiB f32 blocks; never over-pads the batch."""
    if n <= _SUBLANE:
        return n                                  # full (possibly ragged) batch
    target_rows = max(_SUBLANE, (2 * _MiB) // (f_tile * 4))
    tile = _SUBLANE
    while tile * 2 <= min(target_rows, 2048, n):
        tile *= 2
    return tile


def _fused_vmem_estimate(n, f_tile, x_itemsize, out_itemsize):
    # Double-buffered x-in + y-out blocks plus two f32 working copies of the
    # block (upcast + centered values); bf16 inputs therefore budget for the
    # whole-tile f32 materialization explicitly.
    return n * f_tile * (2 * x_itemsize + 2 * out_itemsize + 8)


def _x_block_spec(shape, index_map, extra_buffers):
    """BlockSpec, optionally 3-deep buffered (small-block, long pipelines)."""
    if extra_buffers:
        try:
            return pl.BlockSpec(shape, index_map, pipeline_mode=pl.Buffered(3))
        except Exception:  # older jax without pipeline_mode / Buffered
            pass
    return pl.BlockSpec(shape, index_map)


# ---------------------------------------------------------------------------
# Kernels
# ---------------------------------------------------------------------------

def _bn1d_fused_kernel(x_ref, gamma_ref, beta_ref, y_ref, mean_ref, var_ref,
                       *, eps, inv_n):
    """Single pass over one (N, F_TILE) feature tile (whole batch resident)."""
    x = x_ref[...].astype(jnp.float32)                    # (N, F_TILE)
    # Mean-subtracted variance: matches the PyTorch formula and avoids the
    # E[x^2]-E[x]^2 cancellation.  (If the sublane reduction ever becomes the
    # critical slot, it could be moved to the idle MXU via ones @ x.)
    mean = jnp.sum(x, axis=0, keepdims=True) * inv_n      # (1, F_TILE)
    d = x - mean
    var = jnp.sum(d * d, axis=0, keepdims=True) * inv_n   # biased variance
    inv_std = lax.rsqrt(var + eps)
    scale = gamma_ref[...] * inv_std                      # (1, F_TILE) f32
    y_ref[...] = (d * scale + beta_ref[...]).astype(y_ref.dtype)
    mean_ref[...] = mean
    var_ref[...] = var


def _bn1d_stats_kernel(x_ref, sum_ref, sumsq_ref, *, n_rows):
    """Accumulate per-feature sum / sum-of-squares across the batch grid axis.

    The last batch tile may be ragged (cdiv grid, no padding): rows past the
    true batch size are zeroed before the reduction.
    """
    i = pl.program_id(1)

    @pl.when(i == 0)
    def _():
        sum_ref[...] = jnp.zeros_like(sum_ref)
        sumsq_ref[...] = jnp.zeros_like(sumsq_ref)

    x = x_ref[...].astype(jnp.float32)                    # (N_TILE, F_TILE)
    n_tile = x.shape[0]
    rows = i * n_tile + lax.broadcasted_iota(jnp.int32, x.shape, 0)
    x = jnp.where(rows < n_rows, x, 0.0)
    sum_ref[...] += jnp.sum(x, axis=0, keepdims=True)
    sumsq_ref[...] += jnp.sum(x * x, axis=0, keepdims=True)


def _bn1d_norm_kernel(x_ref, scale_ref, shift_ref, y_ref):
    """y = x * scale + shift with the folded affine applied in f32."""
    x = x_ref[...].astype(jnp.float32)
    y_ref[...] = (x * scale_ref[...] + shift_ref[...]).astype(y_ref.dtype)


# ---------------------------------------------------------------------------
# pallas_call wrappers
# ---------------------------------------------------------------------------

def _normalize_call(x, scale_row, shift_row, n_tile, f_tile, out_dtype,
                    vmem_limit):
    n, f = x.shape
    n_bt = _cdiv(n, n_tile)
    n_ft = _cdiv(f, f_tile)
    blk_bytes = n_tile * f_tile * x.dtype.itemsize
    x_spec = _x_block_spec((n_tile, f_tile), lambda j, i: (i, j),
                           extra_buffers=(blk_bytes <= _MiB and n_bt >= 4))
    return pl.pallas_call(
        _bn1d_norm_kernel,
        grid=(n_ft, n_bt),
        in_specs=[
            x_spec,
            pl.BlockSpec((1, f_tile), lambda j, i: (0, j)),
            pl.BlockSpec((1, f_tile), lambda j, i: (0, j)),
        ],
        out_specs=pl.BlockSpec((n_tile, f_tile), lambda j, i: (i, j)),
        out_shape=jax.ShapeDtypeStruct((n, f), out_dtype),
        compiler_params=pltpu.CompilerParams(
            dimension_semantics=("parallel", "parallel"),
            vmem_limit_bytes=vmem_limit),
    )(x, scale_row, shift_row)


def _batch_stats_call(x, n_tile, f_tile, vmem_limit):
    n, f = x.shape
    n_bt = _cdiv(n, n_tile)
    n_ft = _cdiv(f, f_tile)
    # Feature axis is "parallel" (>= 2 tiles whenever F > 128, so both v7x
    # cores participate); the batch axis is the resident-accumulator axis.
    kernel = functools.partial(_bn1d_stats_kernel, n_rows=n)
    return pl.pallas_call(
        kernel,
        grid=(n_ft, n_bt),
        in_specs=[pl.BlockSpec((n_tile, f_tile), lambda j, i: (i, j))],
        out_specs=(
            pl.BlockSpec((1, f_tile), lambda j, i: (0, j)),
            pl.BlockSpec((1, f_tile), lambda j, i: (0, j)),
        ),
        out_shape=(
            jax.ShapeDtypeStruct((1, f), jnp.float32),
            jax.ShapeDtypeStruct((1, f), jnp.float32),
        ),
        compiler_params=pltpu.CompilerParams(
            dimension_semantics=("parallel", "arbitrary"),
            vmem_limit_bytes=vmem_limit),
    )(x)


def batch_norm_1d(x, gamma, beta, running_mean, running_var,
                  eps=1e-5, momentum=0.1, training=True, force_two_pass=False):
    """BatchNorm1D forward matching the PyTorch module.

    x: (N, F); gamma/beta/running_mean/running_var: (F,).
    Returns (y, new_running_mean, new_running_var).
    """
    n, f = x.shape
    out_dtype = x.dtype
    fused_budget, vmem_limit = _vmem_budgets()

    gamma_row = gamma.astype(jnp.float32).reshape(1, f)
    beta_row = beta.astype(jnp.float32).reshape(1, f)

    if not training:
        # Eval: normalize with running stats (folded scale/shift in f32 glue).
        mean_row = running_mean.astype(jnp.float32).reshape(1, f)
        var_row = running_var.astype(jnp.float32).reshape(1, f)
        inv_std = lax.rsqrt(var_row + eps)
        scale_row = gamma_row * inv_std
        shift_row = beta_row - mean_row * scale_row
        f_tile = _pick_f_tile(f, min_tiles=2)
        n_tile = _pick_n_tile(n, f_tile)
        y = _normalize_call(x, scale_row, shift_row, n_tile, f_tile, out_dtype,
                            vmem_limit)
        return y, running_mean, running_var

    # ---- Training: prefer the single-read fused path whenever it fits VMEM ----
    f_tile = _pick_f_tile(f, min_tiles=4)   # >= 4 grid steps so DMAs pipeline
    while (f_tile > _LANE and
           _fused_vmem_estimate(n, f_tile, x.dtype.itemsize,
                                out_dtype.itemsize) > fused_budget):
        f_tile //= 2                        # narrower tiles extend the window
    use_fused = (not force_two_pass) and (
        _fused_vmem_estimate(n, f_tile, x.dtype.itemsize, out_dtype.itemsize)
        <= fused_budget)

    if use_fused:
        # ---- Path A: whole batch resident per feature tile, one read of x ----
        kernel = functools.partial(_bn1d_fused_kernel,
                                   eps=float(eps), inv_n=1.0 / float(n))
        n_ft = _cdiv(f, f_tile)
        y, mean_row, var_row = pl.pallas_call(
            kernel,
            grid=(n_ft,),
            in_specs=[
                pl.BlockSpec((n, f_tile), lambda j: (0, j)),
                pl.BlockSpec((1, f_tile), lambda j: (0, j)),
                pl.BlockSpec((1, f_tile), lambda j: (0, j)),
            ],
            out_specs=(
                pl.BlockSpec((n, f_tile), lambda j: (0, j)),
                pl.BlockSpec((1, f_tile), lambda j: (0, j)),
                pl.BlockSpec((1, f_tile), lambda j: (0, j)),
            ),
            out_shape=(
                jax.ShapeDtypeStruct((n, f), out_dtype),
                jax.ShapeDtypeStruct((1, f), jnp.float32),
                jax.ShapeDtypeStruct((1, f), jnp.float32),
            ),
            compiler_params=pltpu.CompilerParams(
                dimension_semantics=("parallel",),
                vmem_limit_bytes=vmem_limit),
        )(x, gamma_row, beta_row)
    else:
        # ---- Path B: stats accumulation over batch tiles, then normalize ----
        f_tile = _pick_f_tile(f, min_tiles=2)
        n_tile = _pick_n_tile(n, f_tile)
        sums, sumsqs = _batch_stats_call(x, n_tile, f_tile, vmem_limit)
        inv_n = 1.0 / float(n)
        mean_row = sums * inv_n
        var_row = jnp.maximum(sumsqs * inv_n - mean_row * mean_row, 0.0)
        inv_std = lax.rsqrt(var_row + eps)
        scale_row = gamma_row * inv_std
        shift_row = beta_row - mean_row * scale_row
        y = _normalize_call(x, scale_row, shift_row, n_tile, f_tile, out_dtype,
                            vmem_limit)

    mean = mean_row[0]
    var = var_row[0]
    # Running-stat update (buffer mutation in PyTorch) as glue; the reference
    # module uses the *biased* batch variance here, so we do too.
    new_running_mean = (running_mean * (1.0 - momentum)
                        + momentum * mean.astype(running_mean.dtype))
    new_running_var = (running_var * (1.0 - momentum)
                       + momentum * var.astype(running_var.dtype))
    return y, new_running_mean, new_running_var


if __name__ == "__main__":
    key = jax.random.PRNGKey(0)
    k1, k2, k3, k4, k5, k6 = jax.random.split(key, 6)

    def reference(x, gamma, beta, eps=1e-5):
        mean = jnp.mean(x, axis=0)
        var = jnp.mean((x - mean) ** 2, axis=0)
        return mean, var, gamma * (x - mean) / jnp.sqrt(var + eps) + beta

    # --- Case 1: small aligned shape (batch=8, num_features=32) ---
    N, F = 8, 32
    x = jax.random.normal(k1, (N, F), dtype=jnp.float32)
    gamma = 1.0 + 0.1 * jax.random.normal(k2, (F,), dtype=jnp.float32)
    beta = 0.1 * jax.random.normal(k3, (F,), dtype=jnp.float32)
    running_mean = jnp.zeros((F,), jnp.float32)
    running_var = jnp.ones((F,), jnp.float32)
    mean_ref, var_ref, y_ref = reference(x, gamma, beta)

    # Training, fused single-pass path.
    y, rm, rv = batch_norm_1d(x, gamma, beta, running_mean, running_var,
                              eps=1e-5, momentum=0.1, training=True)
    jax.block_until_ready((y, rm, rv))
    assert jnp.allclose(y, y_ref, atol=1e-4, rtol=1e-4)
    assert jnp.allclose(rm, 0.9 * running_mean + 0.1 * mean_ref, atol=1e-5)
    assert jnp.allclose(rv, 0.9 * running_var + 0.1 * var_ref, atol=1e-5)

    # Training, two-pass (stats accumulate + normalize) path.
    y2, rm2, rv2 = batch_norm_1d(x, gamma, beta, running_mean, running_var,
                                 eps=1e-5, momentum=0.1, training=True,
                                 force_two_pass=True)
    jax.block_until_ready((y2, rm2, rv2))
    assert jnp.allclose(y2, y_ref, atol=1e-4, rtol=1e-4)
    assert jnp.allclose(rv2, 0.9 * running_var + 0.1 * var_ref, atol=1e-5)

    # Eval path (uses running stats).
    ye, _, _ = batch_norm_1d(x, gamma, beta, rm, rv,
                             eps=1e-5, momentum=0.1, training=False)
    jax.block_until_ready(ye)
    ye_ref = gamma * (x - rm) / jnp.sqrt(rv + 1e-5) + beta
    assert jnp.allclose(ye, ye_ref, atol=1e-4, rtol=1e-4)

    # --- Case 2: ragged shape (batch=13, num_features=160) exercising the
    #     masked edge tiles on both axes (no padding / slicing anywhere). ---
    N2, F2 = 13, 160
    x2 = jax.random.normal(k4, (N2, F2), dtype=jnp.float32)
    gamma2 = 1.0 + 0.1 * jax.random.normal(k5, (F2,), dtype=jnp.float32)
    beta2 = 0.1 * jax.random.normal(k6, (F2,), dtype=jnp.float32)
    rm0 = jnp.zeros((F2,), jnp.float32)
    rv0 = jnp.ones((F2,), jnp.float32)
    mean2_ref, var2_ref, y2_ref = reference(x2, gamma2, beta2)

    ya, rma, rva = batch_norm_1d(x2, gamma2, beta2, rm0, rv0, training=True)
    yb, rmb, rvb = batch_norm_1d(x2, gamma2, beta2, rm0, rv0, training=True,
                                 force_two_pass=True)
    jax.block_until_ready((ya, yb, rma, rva, rmb, rvb))
    assert jnp.allclose(ya, y2_ref, atol=1e-4, rtol=1e-4)
    assert jnp.allclose(yb, y2_ref, atol=1e-4, rtol=1e-4)
    assert jnp.allclose(rma, 0.9 * rm0 + 0.1 * mean2_ref, atol=1e-5)
    assert jnp.allclose(rva, 0.9 * rv0 + 0.1 * var2_ref, atol=1e-5)
    assert jnp.allclose(rvb, 0.9 * rv0 + 0.1 * var2_ref, atol=1e-5)

    print("KERNEL_OK")
</pallas_src>

<mosaic_0001>
module attributes {stable_mosaic.version = 11 : i64} {
  func.func @_bn1d_fused_kernel(%arg0: i32, %arg1: memref<8x32xf32, #tpu.memory_space<vmem>>, %arg2: memref<1x32xf32, #tpu.memory_space<vmem>>, %arg3: memref<1x32xf32, #tpu.memory_space<vmem>>, %arg4: memref<8x32xf32, #tpu.memory_space<vmem>>, %arg5: memref<1x32xf32, #tpu.memory_space<vmem>>, %arg6: memref<1x32xf32, #tpu.memory_space<vmem>>) attributes {dimension_semantics = [#tpu.dimension_semantics<parallel>], iteration_bounds = array<i64: 1>, scalar_prefetch = 0 : i64, scratch_operands = 0 : i64, tpu.core_type = #tpu.core_type<tc>, window_params = [{transform_indices = @transform_0, window_bounds = array<i64: 8, 32>}, {transform_indices = @transform_1, window_bounds = array<i64: 1, 32>}, {transform_indices = @transform_2, window_bounds = array<i64: 1, 32>}, {transform_indices = @transform_3, window_bounds = array<i64: 8, 32>}, {transform_indices = @transform_4, window_bounds = array<i64: 1, 32>}, {transform_indices = @transform_5, window_bounds = array<i64: 1, 32>}]} {
    %c0 = arith.constant 0 : index
    %c0_0 = arith.constant 0 : index
    %0 = vector.load %arg1[%c0, %c0_0] : memref<8x32xf32, #tpu.memory_space<vmem>>, vector<8x32xf32>
    %cst = arith.constant dense<0.000000e+00> : vector<32xf32>
    %1 = vector.multi_reduction <add>, %0, %cst [0] : vector<8x32xf32> to vector<32xf32>
    %2 = vector.shape_cast %1 : vector<32xf32> to vector<1x32xf32>
    %cst_1 = arith.constant 1.250000e-01 : f32
    %3 = vector.broadcast %cst_1 : f32 to vector<1x32xf32>
    %4 = arith.mulf %2, %3 : vector<1x32xf32>
    %5 = vector.broadcast %4 : vector<1x32xf32> to vector<8x32xf32>
    %6 = arith.subf %0, %5 : vector<8x32xf32>
    %7 = arith.mulf %6, %6 : vector<8x32xf32>
    %cst_2 = arith.constant dense<0.000000e+00> : vector<32xf32>
    %8 = vector.multi_reduction <add>, %7, %cst_2 [0] : vector<8x32xf32> to vector<32xf32>
    %9 = vector.shape_cast %8 : vector<32xf32> to vector<1x32xf32>
    %cst_3 = arith.constant 1.250000e-01 : f32
    %10 = vector.broadcast %cst_3 : f32 to vector<1x32xf32>
    %11 = arith.mulf %9, %10 : vector<1x32xf32>
    %cst_4 = arith.constant 9.99999974E-6 : f32
    %12 = vector.broadcast %cst_4 : f32 to vector<1x32xf32>
    %13 = arith.addf %11, %12 : vector<1x32xf32>
    %14 = math.rsqrt %13 : vector<1x32xf32>
    %c0_5 = arith.constant 0 : index
    %c0_6 = arith.constant 0 : index
    %15 = vector.load %arg2[%c0_5, %c0_6] : memref<1x32xf32, #tpu.memory_space<vmem>>, vector<1x32xf32>
    %16 = arith.mulf %15, %14 : vector<1x32xf32>
    %17 = vector.broadcast %16 : vector<1x32xf32> to vector<8x32xf32>
    %18 = arith.mulf %6, %17 : vector<8x32xf32>
    %c0_7 = arith.constant 0 : index
    %c0_8 = arith.constant 0 : index
    %19 = vector.load %arg3[%c0_7, %c0_8] : memref<1x32xf32, #tpu.memory_space<vmem>>, vector<1x32xf32>
    %20 = vector.broadcast %19 : vector<1x32xf32> to vector<8x32xf32>
    %21 = arith.addf %18, %20 : vector<8x32xf32>
    %c0_9 = arith.constant 0 : index
    %c0_10 = arith.constant 0 : index
    %22 = vector.load %arg4[%c0_9, %c0_10] : memref<8x32xf32, #tpu.memory_space<vmem>>, vector<8x32xf32>
    tpu.vector_store %arg4[%c0_9, %c0_10], %21 {strides = array<i32>} : memref<8x32xf32, #tpu.memory_space<vmem>>, vector<8x32xf32>,
    %c0_11 = arith.constant 0 : index
    %c0_12 = arith.constant 0 : index
    %23 = vector.load %arg5[%c0_11, %c0_12] : memref<1x32xf32, #tpu.memory_space<vmem>>, vector<1x32xf32>
    tpu.vector_store %arg5[%c0_11, %c0_12], %4 {strides = array<i32>} : memref<1x32xf32, #tpu.memory_space<vmem>>, vector<1x32xf32>,
    %c0_13 = arith.constant 0 : index
    %c0_14 = arith.constant 0 : index
    %24 = vector.load %arg6[%c0_13, %c0_14] : memref<1x32xf32, #tpu.memory_space<vmem>>, vector<1x32xf32>
    tpu.vector_store %arg6[%c0_13, %c0_14], %11 {strides = array<i32>} : memref<1x32xf32, #tpu.memory_space<vmem>>, vector<1x32xf32>,
    return
  }
  func.func @transform_0(%arg0: i32) -> (i32, i32) {
    %c0_i32 = arith.constant 0 : i32
    %c0_i32_0 = arith.constant 0 : i32
    return %c0_i32, %arg0 : i32, i32
  }
  func.func @transform_1(%arg0: i32) -> (i32, i32) {
    %c0_i32 = arith.constant 0 : i32
    %c0_i32_0 = arith.constant 0 : i32
    return %c0_i32, %arg0 : i32, i32
  }
  func.func @transform_2(%arg0: i32) -> (i32, i32) {
    %c0_i32 = arith.constant 0 : i32
    %c0_i32_0 = arith.constant 0 : i32
    return %c0_i32, %arg0 : i32, i32
  }
  func.func @transform_3(%arg0: i32) -> (i32, i32) {
    %c0_i32 = arith.constant 0 : i32
    %c0_i32_0 = arith.constant 0 : i32
    return %c0_i32, %arg0 : i32, i32
  }
  func.func @transform_4(%arg0: i32) -> (i32, i32) {
    %c0_i32 = arith.constant 0 : i32
    %c0_i32_0 = arith.constant 0 : i32
    return %c0_i32, %arg0 : i32, i32
  }
  func.func @transform_5(%arg0: i32) -> (i32, i32) {
    %c0_i32 = arith.constant 0 : i32
    %c0_i32_0 = arith.constant 0 : i32
    return %c0_i32, %arg0 : i32, i32
  }
}

</mosaic_0001>

<bundles_post_ra>
// kernel: tpu_custom_call.1
= control target key start
LH: loop header
LB: loop body
LE: loop exit
PB: predicated region body
PF: predicated region fallthrough
CT: control target
= control target key end

     0   :  { %11 = vsyncpa [#allocation3], 0  ;;  %s336_s0 = inlined_call_operand.hbm [shape: f32[8,32], index: 0, kind: input, shape index: {}]   ;;  %s337_s1 = inlined_call_operand.hbm [shape: f32[1,32], index: 1, kind: input, shape index: {}]   ;;  %s338_s2 = inlined_call_operand.vmem [shape: f32[1,32], index: 2, kind: input, shape index: {}]   ;;  %s339_s3 = inlined_call_operand.hbm [shape: f32[8,32], index: 3, kind: output, shape index: {0}]   ;;  %s340_s4 = inlined_call_operand.hbm [shape: f32[1,32], index: 4, kind: output, shape index: {1}]   ;;  %s341_s5 = inlined_call_operand.hbm [shape: f32[1,32], index: 5, kind: output, shape index: {2}]  }
   0x1   :  { %12 = vsyncpa [#allocation6], 0 }
   0x2   :  { %13 = vsyncpa [#allocation4], 0 }
   0x3   :  { %14 = vsyncpa [#allocation9], 0  ;;  %s20_s20 = sshll.u32 %s336_s0, 4  ;;  %s278_s21 = smov [#allocation2]   ;;  %s21_s20 = int_to_ptr.hbm [resolvable:$true] %s20_s20 }
   0x4   :  { %s22_s22 = sshll.u32 %s278_s21, 4  ;;  %s31_s25 = sshll.u32 %s337_s1, 4  ;;  %s23_s22 = int_to_ptr.vmem [resolvable:$true] %s22_s22  ;;  %s32_s25 = int_to_ptr.hbm [resolvable:$true] %s31_s25 }
   0x5   :  { %25 = dma.hbm_to_vmem [thread:$0]  %s21_s20, 128, %s23_s22, [#allocation3]  }
   0x6   :  { %s279_s26 = smov [#allocation5]  }
   0x7   :  { %s33_s27 = sshll.u32 %s279_s26, 4  ;;  %s34_s27 = int_to_ptr.vmem [resolvable:$true] %s33_s27 }
   0x8   :  { %36 = dma.hbm_to_vmem [thread:$0]  %s32_s25, 16, %s34_s27, [#allocation6]  }
   0x9   :  { %270 = dma.done.wait [#allocation3], 128  }
   0xa   :  { %271 = vsyncadd [#allocation3], 4294967168 }
   0xb   :  { %272 = dma.done.wait [#allocation6], 16  }
   0xc   :  { %273 = vsyncadd [#allocation6], 4294967280  ;;  %vm48_vm0 = vcmask 261120   ;;  %v47_v0 = vld [vmem:[#allocation2] sm:$0xff]  ;;  %s280_s0 = smov [#allocation8]   ;;  %s111_s30 = sshll.u32 %s340_s4, 4  ;;  %s112_s30 = int_to_ptr.hbm [resolvable:$true] %s111_s30 }
   0xd   :  { %v49_v1 = vsel %vm48_vm0, %v47_v0, 0.0  ;;  %s109_s1 = sshll.u32 %s280_s0, 4  ;;  %vm90_vm1 = vcmask 253952   ;;  %s281_s6 = smov [#allocation10]   ;;  %v78_v26 = vld [vmem:[#allocation5] sm:$0x1]  ;;  %s110_s1 = int_to_ptr.vmem [resolvable:$true] %s109_s1 }
   0xe   :  { %v50_v2 = vrot.slane %v49_v1, 4  ;;  %s120_s7 = sshll.u32 %s281_s6, 4  ;;  %s122_s9 = sshll.u32 %s341_s5, 4  ;;  %v147_v30 = vld [vmem:[%s338_s2] ss:$0 sm:$0xff]  ;;  %s121_s7 = int_to_ptr.vmem [resolvable:$true] %s120_s7  ;;  %s123_s9 = int_to_ptr.hbm [resolvable:$true] %s122_s9 }
   0xf   :  { %s282_s11 = smov [#allocation7]   ;;  %s100_s15 = sshll.u32 %s339_s3, 4  ;;  %s101_s15 = int_to_ptr.hbm [resolvable:$true] %s100_s15 }
  0x10   :  { %v51_v3 = vadd.f32 %v50_v2, %v49_v1  ;;  %s98_s12 = sshll.u32 %s282_s11, 4  ;;  %s99_s12 = int_to_ptr.vmem [resolvable:$true] %s98_s12 }
  0x12   :  { %v52_v4 = vrot.slane %v51_v3, 2 }
  0x14   :  { %v53_v5 = vadd.f32 %v52_v4, %v51_v3 }
  0x16   :  { %v54_v6 = vrot.slane %v53_v5, 1 }
  0x18   :  { %v55_v7 = vadd.f32 %v54_v6, %v53_v5 }
  0x1a   :  { %v56_v8 = vmul.f32 0.125, %v55_v7 }
  0x1c   :  { %v57_v9 = vsub.f32 %v47_v0, %v56_v8  ;;  %91 = vst.msk [vmem:[#allocation8] sm:$0x1] %vm90_vm1, %v56_v8 }
  0x1d   :  { %114 = dma.vmem_to_hbm [thread:$0]  %s110_s1, 16, %s112_s30, [#allocation9]  }
  0x1e   :  { %v58_v10 = vmul.f32 %v57_v9, %v57_v9 }
  0x20   :  { %v59_v11 = vsel %vm48_vm0, %v58_v10, 0.0 }
  0x21   :  { %v60_v12 = vrot.slane %v59_v11, 4 }
  0x23   :  { %v61_v13 = vadd.f32 %v60_v12, %v59_v11 }
  0x25   :  { %v62_v14 = vrot.slane %v61_v13, 2 }
  0x27   :  { %v63_v15 = vadd.f32 %v62_v14, %v61_v13 }
  0x29   :  { %v64_v16 = vrot.slane %v63_v15, 1 }
  0x2b   :  { %v65_v17 = vadd.f32 %v64_v16, %v63_v15 }
  0x2d   :  { %v66_v18 = vmul.f32 0.125, %v65_v17 }
  0x2f   :  { %92 = vst.msk [vmem:[#allocation10] sm:$0x1] %vm90_vm1, %v66_v18  ;;  %v67_v19 = vadd.f32 1e-05, %v66_v18 }
  0x30   :  { %125 = dma.vmem_to_hbm [thread:$0]  %s121_s7, 16, %s123_s9, [#allocation9]  }
  0x31   :  { %148 = vrsqrt.f32 %v67_v19  ;;  %vm74_vm2 = vweird.f32 %v67_v19 }
  0x37   :  { %v149_v20 = vpop.eup %148 }
  0x38   :  { %v69_v21 = vmul.f32 %v149_v20, %v67_v19  ;;  %vm75_vm3 = vweird.f32 %v149_v20 }
  0x39   :  { %vm76_vm4 = vmor %vm74_vm2, %vm75_vm3 }
  0x3a   :  { %v70_v22 = vmul.f32 %v149_v20, %v69_v21 }
  0x3c   :  { %v71_v23 = vmul.f32 0.5, %v70_v22 }
  0x3e   :  { %v72_v24 = vsub.f32 1.5, %v71_v23 }
  0x40   :  { %v73_v25 = vmul.f32 %v149_v20, %v72_v24 }
  0x42   :  { %v77_v27 = vsel %vm76_vm4, %v149_v20, %v73_v25 }
  0x43   :  { %v79_v28 = vmul.f32 %v78_v26, %v77_v27 }
  0x45   :  { %v81_v29 = vperm.slane %v79_v28, 0 }
  0x47   :  { %v83_v31 = vmul.f32 %v81_v29, %v57_v9 }
  0x49   :  { %v88_v32 = vadd.f32 %v147_v30, %v83_v31 }
  0x4b   :  { %89 = vst.msk [vmem:[#allocation7] sm:$0xff] %vm48_vm0, %v88_v32 }
  0x4c   :  { %103 = dma.vmem_to_hbm [thread:$0]  %s99_s12, 128, %s101_s15, [#allocation4]  }
  0x4d   :  { %274 = dma.done.wait [#allocation4], 128  }
  0x4e   :  { %275 = vsyncadd [#allocation4], 4294967168 }
  0x4f   :  { %276 = dma.done.wait [#allocation9], 32  }
  0x50   :  { %277 = vsyncadd [#allocation9], 4294967264 }
  0x51   :  { %138 = vsyncpa [#allocation3], 1 }
  0x52   :  { %139 = vsyncpa [#allocation6], 1 }
  0x53   :  { %140 = vsyncpa [#allocation4], 1 }
  0x54   :  { %141 = vsyncpa [#allocation9], 1 }

</bundles_post_ra>
